<compile_context>
chip_gen: v5e
topology: v5e:2x2
jax: 0.10.0
libtpu: 0.0.40
codegen_flags: <defaults>
</compile_context>

<pallas_src>
import functools

import jax
import jax.numpy as jnp
from jax.experimental import pallas as pl
from jax.experimental.pallas import tpu as pltpu

BN_EPS = 1e-5            # nn.BatchNorm1d default
LEAKY_SLOPE = 0.01       # nn.LeakyReLU default
LANE = 128               # TPU lane width


def _round_up(x, m):
    return ((x + m - 1) // m) * m


def _vmem_capacity():
    try:
        return int(pltpu.get_tpu_info().vmem_capacity_bytes)
    except Exception:
        return 64 << 20   # conservative default (v7x per-TensorCore VMEM)


def _raw_vmem(buffers, intermediates):
    # buffers: list of (num_buffers, num_elements, itemsize)
    return sum(nb * n * b for nb, n, b in buffers) + intermediates


def _vmem_limit(raw_bytes):
    return int(min(_vmem_capacity(), max(16 << 20, raw_bytes + (4 << 20))))


# --------------------------------------------------------------------------
# Pass 1: per-tile matmul + shifted per-channel sum / sum-of-squares.
# Optionally also stores z so pass 2 can skip the second matmul.
# --------------------------------------------------------------------------
def _stats_kernel(x_ref, w_ref, mu_ref, *out_refs,
                  n_valid, tn, nh, store_z, has_padding):
    if store_z:
        sum_ref, sq_ref, z_ref = out_refs
    else:
        sum_ref, sq_ref = out_refs

    c = pl.program_id(0)
    j = pl.program_id(1)

    @pl.when(j == 0)
    def _():
        sum_ref[...] = jnp.zeros_like(sum_ref)
        sq_ref[...] = jnp.zeros_like(sq_ref)

    # x_ref: (TN, Cin)   w_ref: (Cout_p, Cin)  -> z: (TN, Cout_p), f32 acc.
    z = jax.lax.dot_general(
        x_ref[...], w_ref[...],
        dimension_numbers=(((1,), (1,)), ((), ())),
        preferred_element_type=jnp.float32)

    if store_z:
        z_ref[...] = z.astype(z_ref.dtype)

    mu = mu_ref[...]                    # (1, Cout_p) approximate channel mean

    def _accumulate(d):
        sum_ref[...] += jnp.sum(d, axis=0, keepdims=True).reshape(sum_ref.shape)
        sq_ref[...] += jnp.sum(d * d, axis=0, keepdims=True).reshape(sq_ref.shape)

    if not has_padding:
        _accumulate(z - mu)
    else:
        tile_start = (c * nh + j) * tn

        @pl.when(tile_start + tn <= n_valid)       # full tile: no mask cost
        def _():
            _accumulate(z - mu)

        @pl.when(tile_start + tn > n_valid)        # boundary tile: mask pad rows
        def _():
            rows = jax.lax.broadcasted_iota(jnp.int32, (z.shape[0], 1), 0)
            valid = (tile_start + rows) < n_valid
            _accumulate(jnp.where(valid, z - mu, 0.0))


# --------------------------------------------------------------------------
# Pass 2a (recompute): matmul with scale-folded weight + shift + LeakyReLU.
# --------------------------------------------------------------------------
def _apply_matmul_kernel(x_ref, w2_ref, shift_ref, o_ref):
    y = jax.lax.dot_general(
        x_ref[...], w2_ref[...],
        dimension_numbers=(((1,), (1,)), ((), ())),
        preferred_element_type=jnp.float32)
    y = y + shift_ref[...]
    o_ref[...] = jnp.maximum(y, LEAKY_SLOPE * y).astype(o_ref.dtype)


# --------------------------------------------------------------------------
# Pass 2b (store-z): pure elementwise affine + LeakyReLU over aliased z.
# --------------------------------------------------------------------------
def _apply_affine_kernel(z_ref, scale_ref, shift_ref, o_ref):
    y = z_ref[...].astype(jnp.float32) * scale_ref[...] + shift_ref[...]
    o_ref[...] = jnp.maximum(y, LEAKY_SLOPE * y).astype(o_ref.dtype)


@functools.partial(jax.jit, static_argnames=("tile_n", "mxu_dtype", "store_z"))
def sparse_linear_block(x, weight, gamma, beta, *, tile_n=512, mxu_dtype=None,
                        store_z=None):
    """x: (N, C_in); weight: (C_out, C_in); gamma/beta: (C_out,)."""
    n, c_in = x.shape
    c_out = weight.shape[0]
    out_dtype = x.dtype

    cdt = jnp.dtype(mxu_dtype) if mxu_dtype is not None else jnp.dtype(x.dtype)
    in_b = cdt.itemsize
    out_b = jnp.dtype(out_dtype).itemsize

    # Persist z (skip the second matmul) in the compute-bound regime.
    if store_z is None:
        store_z = c_in >= 256

    # Lane-align only the output channels; Cin stays unpadded.
    cout_p = _round_up(c_out, LANE)

    # Dtype-aware sublane rounding (f32: 8, bf16: 16, int8/fp8: 32).
    sub = max(8, 32 // in_b)

    cap = _vmem_capacity()

    def _estimates(tn_):
        p1 = [(2, tn_ * c_in, in_b),          # x tile (double-buffered)
              (1, cout_p * c_in, in_b),       # weight (single-buffered)
              (1, cout_p, 4),                 # mu
              (1, cout_p, 4), (1, cout_p, 4)]  # resident sum / sumsq outputs
        if store_z:
            p1.append((2, tn_ * cout_p, out_b))
        raw1 = _raw_vmem(p1, 4 * tn_ * cout_p * 4)   # z, d, d*d, temps (f32)
        if store_z:
            p2 = [(2, tn_ * cout_p, out_b), (1, cout_p, 4), (1, cout_p, 4),
                  (2, tn_ * cout_p, out_b)]
        else:
            p2 = [(2, tn_ * c_in, in_b), (1, cout_p * c_in, in_b),
                  (1, cout_p, 4), (2, tn_ * cout_p, out_b)]
        raw2 = _raw_vmem(p2, 3 * tn_ * cout_p * 4)   # y + temps (f32)
        return raw1, raw2

    tn = min(_round_up(tile_n, sub), _round_up(n, sub))
    while tn > sub:                       # shrink tile until it actually fits
        if max(_estimates(tn)) + (4 << 20) <= int(0.8 * cap):
            break
        tn = max(sub, _round_up(tn // 2, sub))
    raw1, raw2 = _estimates(tn)
    vmem1, vmem2 = _vmem_limit(raw1), _vmem_limit(raw2)

    num_tiles = -(-n // tn)
    n_split = 2 if num_tiles >= 2 else 1          # split pass-1 stats over 2 TCs
    num_tiles_p = _round_up(num_tiles, n_split)
    nh = num_tiles_p // n_split
    n_pad = num_tiles_p * tn
    has_padding = (n_pad != n)

    x_p = x.astype(cdt)
    if has_padding:
        x_p = jnp.pad(x_p, ((0, n_pad - n), (0, 0)))

    w32 = jnp.pad(weight.astype(jnp.float32), ((0, cout_p - c_out), (0, 0)))
    w1 = w32.astype(cdt)

    # Approximate per-channel mean of z (exact for ideal z in f32), used as the
    # shift in the pass-1 statistics -> numerically robust variance.
    col_mean = jnp.mean(x.astype(jnp.float32), axis=0, keepdims=True)  # (1, Cin)
    mu = jnp.dot(col_mean, w32.T)                                      # (1, Cout_p)

    # ---------------- pass 1: shifted batch statistics (+ optional z) -------
    stats_kernel = functools.partial(
        _stats_kernel, n_valid=n, tn=tn, nh=nh, store_z=store_z,
        has_padding=has_padding)

    out_shapes = [jax.ShapeDtypeStruct((n_split, 1, cout_p), jnp.float32),
                  jax.ShapeDtypeStruct((n_split, 1, cout_p), jnp.float32)]
    out_specs = [pl.BlockSpec((1, 1, cout_p), lambda c, j: (c, 0, 0)),
                 pl.BlockSpec((1, 1, cout_p), lambda c, j: (c, 0, 0))]
    if store_z:
        out_shapes.append(jax.ShapeDtypeStruct((n_pad, cout_p), out_dtype))
        out_specs.append(pl.BlockSpec((tn, cout_p),
                                      lambda c, j: (c * nh + j, 0)))

    pass1 = pl.pallas_call(
        stats_kernel,
        out_shape=tuple(out_shapes),
        grid_spec=pltpu.PrefetchScalarGridSpec(
            num_scalar_prefetch=0,
            grid=(n_split, nh),
            in_specs=[
                pl.BlockSpec((tn, c_in), lambda c, j: (c * nh + j, 0)),
                pl.BlockSpec((cout_p, c_in), lambda c, j: (0, 0),
                             pipeline_mode=pl.Buffered(1)),
                pl.BlockSpec((1, cout_p), lambda c, j: (0, 0),
                             pipeline_mode=pl.Buffered(1)),
            ],
            out_specs=tuple(out_specs)),
        compiler_params=pltpu.CompilerParams(
            dimension_semantics=("parallel", "arbitrary"),
            vmem_limit_bytes=vmem1),
    )(x_p, w1, mu)

    if store_z:
        sums, sqs, z_buf = pass1
    else:
        sums, sqs = pass1

    # Fold BatchNorm into a single per-channel affine (tiny, stays in XLA).
    inv_n = jnp.float32(1.0 / n)                       # true point count
    sum_d = jnp.sum(sums, axis=(0, 1))                 # combine per-core partials
    sum_dd = jnp.sum(sqs, axis=(0, 1))
    mean_d = sum_d * inv_n
    var = jnp.maximum(sum_dd * inv_n - mean_d * mean_d, 0.0)   # biased variance
    mean = mu[0] + mean_d
    inv_std = jax.lax.rsqrt(var + BN_EPS)

    gamma_p = jnp.pad(gamma.astype(jnp.float32), (0, cout_p - c_out))
    beta_p = jnp.pad(beta.astype(jnp.float32), (0, cout_p - c_out))
    scale = gamma_p * inv_std                          # (Cout_p,)
    shift = (beta_p - mean * scale).reshape(1, cout_p)

    # ---------------- pass 2: normalize + LeakyReLU --------------------------
    if store_z:
        out_p = pl.pallas_call(
            _apply_affine_kernel,
            out_shape=jax.ShapeDtypeStruct((n_pad, cout_p), out_dtype),
            grid_spec=pltpu.PrefetchScalarGridSpec(
                num_scalar_prefetch=0,
                grid=(num_tiles_p,),
                in_specs=[
                    pl.BlockSpec((tn, cout_p), lambda i: (i, 0)),
                    pl.BlockSpec((1, cout_p), lambda i: (0, 0),
                                 pipeline_mode=pl.Buffered(1)),
                    pl.BlockSpec((1, cout_p), lambda i: (0, 0),
                                 pipeline_mode=pl.Buffered(1)),
                ],
                out_specs=pl.BlockSpec((tn, cout_p), lambda i: (i, 0))),
            compiler_params=pltpu.CompilerParams(
                dimension_semantics=("parallel",),
                vmem_limit_bytes=vmem2),
            input_output_aliases={0: 0},               # overwrite z in place
        )(z_buf, scale.reshape(1, cout_p), shift)
    else:
        # Fold the BN scale into the weight so the kernel only adds the shift.
        w2 = (w32 * scale[:, None]).astype(cdt)
        out_p = pl.pallas_call(
            _apply_matmul_kernel,
            out_shape=jax.ShapeDtypeStruct((n_pad, cout_p), out_dtype),
            grid_spec=pltpu.PrefetchScalarGridSpec(
                num_scalar_prefetch=0,
                grid=(num_tiles_p,),
                in_specs=[
                    pl.BlockSpec((tn, c_in), lambda i: (i, 0)),
                    pl.BlockSpec((cout_p, c_in), lambda i: (0, 0),
                                 pipeline_mode=pl.Buffered(1)),
                    pl.BlockSpec((1, cout_p), lambda i: (0, 0),
                                 pipeline_mode=pl.Buffered(1)),
                ],
                out_specs=pl.BlockSpec((tn, cout_p), lambda i: (i, 0))),
            compiler_params=pltpu.CompilerParams(
                dimension_semantics=("parallel",),
                vmem_limit_bytes=vmem2),
        )(x_p, w2, shift)

    # Drop padded rows / channels.
    return out_p[:n, :c_out]


def _reference(x, weight, gamma, beta):
    z = x @ weight.T
    mean = z.mean(axis=0, keepdims=True)
    var = ((z - mean) ** 2).mean(axis=0, keepdims=True)
    y = (z - mean) / jnp.sqrt(var + BN_EPS) * gamma + beta
    return jnp.where(y > 0, y, LEAKY_SLOPE * y)


if __name__ == "__main__":
    key = jax.random.PRNGKey(0)
    k_x, k_w, k_x2 = jax.random.split(key, 3)

    N, C_IN, C_OUT = 64, 32, 64              # N sparse points, in/out channels

    x = jax.random.normal(k_x, (N, C_IN), dtype=jnp.float32)
    bound = 1.0 / float(C_IN) ** 0.5
    weight = jax.random.uniform(k_w, (C_OUT, C_IN), dtype=jnp.float32,
                                minval=-bound, maxval=bound)
    gamma = jnp.ones((C_OUT,), dtype=jnp.float32)     # BatchNorm default init
    beta = jnp.zeros((C_OUT,), dtype=jnp.float32)

    ref = _reference(x, weight, gamma, beta)

    # 1) f32 recompute path: strict check.
    out = jax.block_until_ready(sparse_linear_block(x, weight, gamma, beta))
    assert out.shape == (N, C_OUT)
    assert jnp.allclose(out, ref, atol=1e-4, rtol=1e-4)

    # 2) stored-z path (pass 2 = aliased elementwise affine + LeakyReLU).
    out_z = jax.block_until_ready(
        sparse_linear_block(x, weight, gamma, beta, store_z=True))
    assert jnp.allclose(out_z, ref, atol=1e-4, rtol=1e-4)

    # 3) bf16 MXU path (f32 accumulation, f32 BN stats) — loose tolerance.
    out_bf16 = jax.block_until_ready(
        sparse_linear_block(x, weight, gamma, beta, mxu_dtype=jnp.bfloat16))
    assert out_bf16.shape == (N, C_OUT)
    assert jnp.allclose(out_bf16, ref, atol=1e-1, rtol=1e-1)

    # 4) robustness: |mean| >> std (would break E[z^2]-E[z]^2) and a ragged N
    #    that exercises the masked, multi-tile, two-partial-stat path.
    N2 = 200
    x2 = jax.random.normal(k_x2, (N2, C_IN), dtype=jnp.float32) + 1000.0
    ref2 = _reference(x2, weight, gamma, beta)
    out2 = jax.block_until_ready(
        sparse_linear_block(x2, weight, gamma, beta, tile_n=64))
    assert out2.shape == (N2, C_OUT)
    assert jnp.allclose(out2, ref2, atol=1e-2, rtol=1e-2)

    print("KERNEL_OK")
</pallas_src>

<mosaic_0001>
module attributes {stable_mosaic.version = 11 : i64} {
  func.func @_apply_matmul_kernel(%arg0: i32, %arg1: memref<64x32xf32, #tpu.memory_space<vmem>>, %arg2: memref<128x32xf32, #tpu.memory_space<vmem>>, %arg3: memref<1x128xf32, #tpu.memory_space<vmem>>, %arg4: memref<64x128xf32, #tpu.memory_space<vmem>>) attributes {dimension_semantics = [#tpu.dimension_semantics<parallel>], iteration_bounds = array<i64: 1>, scalar_prefetch = 0 : i64, scratch_operands = 0 : i64, tpu.core_type = #tpu.core_type<tc>, window_params = [{transform_indices = @transform_0, window_bounds = array<i64: 64, 32>}, {pipeline_mode = #tpu.pipeline_mode<synchronous>, transform_indices = @transform_1, window_bounds = array<i64: 128, 32>}, {pipeline_mode = #tpu.pipeline_mode<synchronous>, transform_indices = @transform_2, window_bounds = array<i64: 1, 128>}, {transform_indices = @transform_3, window_bounds = array<i64: 64, 128>}]} {
    %c0 = arith.constant 0 : index
    %c0_0 = arith.constant 0 : index
    %0 = vector.load %arg1[%c0, %c0_0] : memref<64x32xf32, #tpu.memory_space<vmem>>, vector<64x32xf32>
    %c0_1 = arith.constant 0 : index
    %c0_2 = arith.constant 0 : index
    %1 = vector.load %arg2[%c0_1, %c0_2] : memref<128x32xf32, #tpu.memory_space<vmem>>, vector<128x32xf32>
    %cst = arith.constant dense<0.000000e+00> : vector<64x128xf32>
    %2 = tpu.matmul %0, %1, %cst {dimension_numbers = #tpu.dot_dimension_numbers<[1], [1], [0], [0], [0, 0, 1, 0], [], []>} : vector<64x32xf32>, vector<128x32xf32>, vector<64x128xf32> -> vector<64x128xf32>
    %c0_3 = arith.constant 0 : index
    %c0_4 = arith.constant 0 : index
    %3 = vector.load %arg3[%c0_3, %c0_4] : memref<1x128xf32, #tpu.memory_space<vmem>>, vector<1x128xf32>
    %4 = vector.broadcast %3 : vector<1x128xf32> to vector<64x128xf32>
    %5 = arith.addf %2, %4 : vector<64x128xf32>
    %cst_5 = arith.constant 0.00999999977 : f32
    %6 = vector.broadcast %cst_5 : f32 to vector<64x128xf32>
    %7 = arith.mulf %6, %5 : vector<64x128xf32>
    %8 = arith.maximumf %5, %7 : vector<64x128xf32>
    %c0_6 = arith.constant 0 : index
    %c0_7 = arith.constant 0 : index
    %9 = vector.load %arg4[%c0_6, %c0_7] : memref<64x128xf32, #tpu.memory_space<vmem>>, vector<64x128xf32>
    tpu.vector_store %arg4[%c0_6, %c0_7], %8 {strides = array<i32>} : memref<64x128xf32, #tpu.memory_space<vmem>>, vector<64x128xf32>,
    return
  }
  func.func @transform_0(%arg0: i32) -> (i32, i32) {
    %c0_i32 = arith.constant 0 : i32
    %c0_i32_0 = arith.constant 0 : i32
    return %arg0, %c0_i32 : i32, i32
  }
  func.func @transform_1(%arg0: i32) -> (i32, i32) {
    %c0_i32 = arith.constant 0 : i32
    %c0_i32_0 = arith.constant 0 : i32
    %c0_i32_1 = arith.constant 0 : i32
    return %c0_i32, %c0_i32_0 : i32, i32
  }
  func.func @transform_2(%arg0: i32) -> (i32, i32) {
    %c0_i32 = arith.constant 0 : i32
    %c0_i32_0 = arith.constant 0 : i32
    %c0_i32_1 = arith.constant 0 : i32
    return %c0_i32, %c0_i32_0 : i32, i32
  }
  func.func @transform_3(%arg0: i32) -> (i32, i32) {
    %c0_i32 = arith.constant 0 : i32
    %c0_i32_0 = arith.constant 0 : i32
    return %arg0, %c0_i32 : i32, i32
  }
}

module attributes {stable_mosaic.version = 11 : i64} {
  func.func @_stats_kernel(%arg0: i32, %arg1: i32, %arg2: memref<64x32xf32, #tpu.memory_space<vmem>>, %arg3: memref<128x32xf32, #tpu.memory_space<vmem>>, %arg4: memref<1x128xf32, #tpu.memory_space<vmem>>, %arg5: memref<1x1x128xf32, #tpu.memory_space<vmem>>, %arg6: memref<1x1x128xf32, #tpu.memory_space<vmem>>) attributes {dimension_semantics = [#tpu.dimension_semantics<parallel>, #tpu.dimension_semantics<arbitrary>], iteration_bounds = array<i64: 1, 1>, scalar_prefetch = 0 : i64, scratch_operands = 0 : i64, tpu.core_type = #tpu.core_type<tc>, window_params = [{transform_indices = @transform_0, window_bounds = array<i64: 64, 32>}, {pipeline_mode = #tpu.pipeline_mode<synchronous>, transform_indices = @transform_1, window_bounds = array<i64: 128, 32>}, {pipeline_mode = #tpu.pipeline_mode<synchronous>, transform_indices = @transform_2, window_bounds = array<i64: 1, 128>}, {transform_indices = @transform_3, window_bounds = array<i64: 1, 1, 128>}, {transform_indices = @transform_4, window_bounds = array<i64: 1, 1, 128>}]} {
    %c0_i32 = arith.constant 0 : i32
    %0 = arith.cmpi eq, %arg1, %c0_i32 : i32
    %1 = arith.extui %0 : i1 to i32
    %c0_i32_0 = arith.constant 0 : i32
    %2 = arith.cmpi ne, %1, %c0_i32_0 : i32
    scf.if %2 {
      %cst_20 = arith.constant 0.000000e+00 : f32
      %22 = vector.broadcast %cst_20 : f32 to vector<1x1x128xf32>
      %c0_21 = arith.constant 0 : index
      %c0_22 = arith.constant 0 : index
      %c0_23 = arith.constant 0 : index
      %23 = vector.load %arg5[%c0_21, %c0_22, %c0_23] : memref<1x1x128xf32, #tpu.memory_space<vmem>>, vector<1x1x128xf32>
      tpu.vector_store %arg5[%c0_21, %c0_22, %c0_23], %22 {strides = array<i32>} : memref<1x1x128xf32, #tpu.memory_space<vmem>>, vector<1x1x128xf32>,
      %cst_24 = arith.constant 0.000000e+00 : f32
      %24 = vector.broadcast %cst_24 : f32 to vector<1x1x128xf32>
      %c0_25 = arith.constant 0 : index
      %c0_26 = arith.constant 0 : index
      %c0_27 = arith.constant 0 : index
      %25 = vector.load %arg6[%c0_25, %c0_26, %c0_27] : memref<1x1x128xf32, #tpu.memory_space<vmem>>, vector<1x1x128xf32>
      tpu.vector_store %arg6[%c0_25, %c0_26, %c0_27], %24 {strides = array<i32>} : memref<1x1x128xf32, #tpu.memory_space<vmem>>, vector<1x1x128xf32>,
    } else {
    }
    %c0 = arith.constant 0 : index
    %c0_1 = arith.constant 0 : index
    %3 = vector.load %arg2[%c0, %c0_1] : memref<64x32xf32, #tpu.memory_space<vmem>>, vector<64x32xf32>
    %c0_2 = arith.constant 0 : index
    %c0_3 = arith.constant 0 : index
    %4 = vector.load %arg3[%c0_2, %c0_3] : memref<128x32xf32, #tpu.memory_space<vmem>>, vector<128x32xf32>
    %cst = arith.constant dense<0.000000e+00> : vector<64x128xf32>
    %5 = tpu.matmul %3, %4, %cst {dimension_numbers = #tpu.dot_dimension_numbers<[1], [1], [0], [0], [0, 0, 1, 0], [], []>} : vector<64x32xf32>, vector<128x32xf32>, vector<64x128xf32> -> vector<64x128xf32>
    %c0_4 = arith.constant 0 : index
    %c0_5 = arith.constant 0 : index
    %6 = vector.load %arg4[%c0_4, %c0_5] : memref<1x128xf32, #tpu.memory_space<vmem>>, vector<1x128xf32>
    %7 = vector.broadcast %6 : vector<1x128xf32> to vector<64x128xf32>
    %8 = arith.subf %5, %7 : vector<64x128xf32>
    %c0_6 = arith.constant 0 : index
    %c0_7 = arith.constant 0 : index
    %c0_8 = arith.constant 0 : index
    %9 = vector.load %arg5[%c0_6, %c0_7, %c0_8] : memref<1x1x128xf32, #tpu.memory_space<vmem>>, vector<1x1x128xf32>
    %cst_9 = arith.constant dense<0.000000e+00> : vector<128xf32>
    %10 = vector.multi_reduction <add>, %8, %cst_9 [0] : vector<64x128xf32> to vector<128xf32>
    %11 = vector.shape_cast %10 : vector<128xf32> to vector<1x128xf32>
    %12 = vector.shape_cast %11 : vector<1x128xf32> to vector<1x1x128xf32>
    %13 = arith.addf %9, %12 : vector<1x1x128xf32>
    %c0_10 = arith.constant 0 : index
    %c0_11 = arith.constant 0 : index
    %c0_12 = arith.constant 0 : index
    %14 = vector.load %arg5[%c0_10, %c0_11, %c0_12] : memref<1x1x128xf32, #tpu.memory_space<vmem>>, vector<1x1x128xf32>
    tpu.vector_store %arg5[%c0_10, %c0_11, %c0_12], %13 {strides = array<i32>} : memref<1x1x128xf32, #tpu.memory_space<vmem>>, vector<1x1x128xf32>,
    %c0_13 = arith.constant 0 : index
    %c0_14 = arith.constant 0 : index
    %c0_15 = arith.constant 0 : index
    %15 = vector.load %arg6[%c0_13, %c0_14, %c0_15] : memref<1x1x128xf32, #tpu.memory_space<vmem>>, vector<1x1x128xf32>
    %16 = arith.mulf %8, %8 : vector<64x128xf32>
    %cst_16 = arith.constant dense<0.000000e+00> : vector<128xf32>
    %17 = vector.multi_reduction <add>, %16, %cst_16 [0] : vector<64x128xf32> to vector<128xf32>
    %18 = vector.shape_cast %17 : vector<128xf32> to vector<1x128xf32>
    %19 = vector.shape_cast %18 : vector<1x128xf32> to vector<1x1x128xf32>
    %20 = arith.addf %15, %19 : vector<1x1x128xf32>
    %c0_17 = arith.constant 0 : index
    %c0_18 = arith.constant 0 : index
    %c0_19 = arith.constant 0 : index
    %21 = vector.load %arg6[%c0_17, %c0_18, %c0_19] : memref<1x1x128xf32, #tpu.memory_space<vmem>>, vector<1x1x128xf32>
    tpu.vector_store %arg6[%c0_17, %c0_18, %c0_19], %20 {strides = array<i32>} : memref<1x1x128xf32, #tpu.memory_space<vmem>>, vector<1x1x128xf32>,
    return
  }
  func.func @transform_0(%arg0: i32, %arg1: i32) -> (i32, i32) {
    %c1_i32 = arith.constant 1 : i32
    %0 = arith.muli %arg0, %c1_i32 : i32
    %1 = arith.addi %0, %arg1 : i32
    %c0_i32 = arith.constant 0 : i32
    %c0_i32_0 = arith.constant 0 : i32
    return %1, %c0_i32 : i32, i32
  }
  func.func @transform_1(%arg0: i32, %arg1: i32) -> (i32, i32) {
    %c0_i32 = arith.constant 0 : i32
    %c0_i32_0 = arith.constant 0 : i32
    %c0_i32_1 = arith.constant 0 : i32
    return %c0_i32, %c0_i32_0 : i32, i32
  }
  func.func @transform_2(%arg0: i32, %arg1: i32) -> (i32, i32) {
    %c0_i32 = arith.constant 0 : i32
    %c0_i32_0 = arith.constant 0 : i32
    %c0_i32_1 = arith.constant 0 : i32
    return %c0_i32, %c0_i32_0 : i32, i32
  }
  func.func @transform_3(%arg0: i32, %arg1: i32) -> (i32, i32, i32) {
    %c0_i32 = arith.constant 0 : i32
    %c0_i32_0 = arith.constant 0 : i32
    %c0_i32_1 = arith.constant 0 : i32
    return %arg0, %c0_i32, %c0_i32_0 : i32, i32, i32
  }
  func.func @transform_4(%arg0: i32, %arg1: i32) -> (i32, i32, i32) {
    %c0_i32 = arith.constant 0 : i32
    %c0_i32_0 = arith.constant 0 : i32
    %c0_i32_1 = arith.constant 0 : i32
    return %arg0, %c0_i32, %c0_i32_0 : i32, i32, i32
  }
}

</mosaic_0001>

<bundles_post_ra>
// kernel: sparse_linear_block.3
= control target key start
LH: loop header
LB: loop body
LE: loop exit
PB: predicated region body
PF: predicated region fallthrough
CT: control target
= control target key end

     0   :  { %vm43_vm0 = vcmask 261120   ;;  %s474_s0 = inlined_call_operand.vmem [shape: f32[64,32], index: 0, kind: input, shape index: {}]   ;;  %s475_s1 = inlined_call_operand.vmem [shape: f32[128,32], index: 1, kind: input, shape index: {}]   ;;  %s476_s2 = inlined_call_operand.vmem [shape: f32[1,128], index: 2, kind: input, shape index: {}]   ;;  %s477_s3 = inlined_call_operand.hbm [shape: f32[64,128], index: 3, kind: output, shape index: {}]  }
   0x1   :  { %v38_v0 = vld [vmem:[%s475_s1 + $0x78] sm:$0xff]  ;;  %v37_v1 = vld [vmem:[%s475_s1 + $0x70] sm:$0xff] }
   0x2   :  { %224 = vmatpush.xpose.msk.msra.mxu2 %vm43_vm0, %v38_v0  ;;  %225 = vmatpush.xpose.msk.msra.mxu3 %vm43_vm0, %v38_v0 }
   0x3   :  { %199 = vmatpush.xpose.msk.msra.mxu0 %vm43_vm0, %v38_v0  ;;  %223 = vmatpush.xpose.msk.msra.mxu1 %vm43_vm0, %v38_v0 }
   0x4   :  { %8 = vsyncpa [#allocation3], 0  ;;  %v36_v2 = vld [vmem:[%s475_s1 + $0x68] sm:$0xff]  ;;  %v35_v3 = vld [vmem:[%s475_s1 + $0x60] sm:$0xff]  ;;  %s187_s9 = sshll.u32 %s477_s3, 4  ;;  %s302_s10 = smov 128   ;;  %s188_s9 = int_to_ptr.hbm [resolvable:$true] %s187_s9 }
   0x5   :  { %v34_v4 = vld [vmem:[%s475_s1 + $0x58] sm:$0xff]  ;;  %v33_v5 = vld [vmem:[%s475_s1 + $0x50] sm:$0xff]  ;;  %v32_v6 = vld [vmem:[%s475_s1 + $0x48] sm:$0xff]  ;;  %s303_s11 = smov 8  }
   0x6   :  { %227 = vmatpush.xpose.msk.msra.mxu2 %vm43_vm0, %v37_v1  ;;  %228 = vmatpush.xpose.msk.msra.mxu3 %vm43_vm0, %v37_v1  ;;  %v31_v7 = vld [vmem:[%s475_s1 + $0x40] sm:$0xff]  ;;  %v30_v8 = vld [vmem:[%s475_s1 + $0x38] sm:$0xff]  ;;  %v29_v9 = vld [vmem:[%s475_s1 + $0x30] sm:$0xff] }
   0x7   :  { %200 = vmatpush.xpose.msk.msra.mxu0 %vm43_vm0, %v37_v1  ;;  %226 = vmatpush.xpose.msk.msra.mxu1 %vm43_vm0, %v37_v1  ;;  %v28_v10 = vld [vmem:[%s475_s1 + $0x28] sm:$0xff]  ;;  %v27_v11 = vld [vmem:[%s475_s1 + $0x20] sm:$0xff]  ;;  %v26_v12 = vld [vmem:[%s475_s1 + $0x18] sm:$0xff] }
   0x8   :  { %v25_v13 = vld [vmem:[%s475_s1 + $0x10] sm:$0xff]  ;;  %v24_v14 = vld [vmem:[%s475_s1 + $0x8] sm:$0xff]  ;;  %v23_v15 = vld [vmem:[%s475_s1] sm:$0xff] }
   0x9   :  { %v19_v16 = vld [vmem:[%s474_s0 + $0x20] sm:$0xff]  ;;  %v21_v17 = vld [vmem:[%s474_s0 + $0x30] sm:$0xff]  ;;  %v20_v20 = vld [vmem:[%s474_s0 + $0x28] sm:$0xff] }
   0xa   :  { %230 = vmatpush.xpose.msk.msra.mxu2 %vm43_vm0, %v36_v2  ;;  %231 = vmatpush.xpose.msk.msra.mxu3 %vm43_vm0, %v36_v2  ;;  %v15_v18 = vld [vmem:[%s474_s0] sm:$0xff]  ;;  %v17_v19 = vld [vmem:[%s474_s0 + $0x10] sm:$0xff]  ;;  %v22_v21 = vld [vmem:[%s474_s0 + $0x38] sm:$0xff] }
   0xb   :  { %201 = vmatpush.xpose.msk.msra.mxu0 %vm43_vm0, %v36_v2  ;;  %229 = vmatpush.xpose.msk.msra.mxu1 %vm43_vm0, %v36_v2  ;;  %v16_v22 = vld [vmem:[%s474_s0 + $0x8] sm:$0xff]  ;;  %v18_v23 = vld [vmem:[%s474_s0 + $0x18] sm:$0xff]  ;;  %v274_v24 = vld [vmem:[%s476_s2] ss:$0 sm:$0xff]  ;;  %s301_s0 = smov [#allocation2]  }
   0xc   :  { %s185_s2 = sshll.u32 %s301_s0, 4  ;;  %s186_s2 = int_to_ptr.vmem [resolvable:$true] %s185_s2 }
   0xe   :  { %233 = vmatpush.xpose.msk.msra.mxu2 %vm43_vm0, %v35_v3  ;;  %234 = vmatpush.xpose.msk.msra.mxu3 %vm43_vm0, %v35_v3 }
   0xf   :  { %202 = vmatpush.xpose.msk.msra.mxu0 %vm43_vm0, %v35_v3  ;;  %232 = vmatpush.xpose.msk.msra.mxu1 %vm43_vm0, %v35_v3 }
  0x12   :  { %236 = vmatpush.xpose.msk.msra.mxu2 %vm43_vm0, %v34_v4  ;;  %237 = vmatpush.xpose.msk.msra.mxu3 %vm43_vm0, %v34_v4 }
  0x13   :  { %203 = vmatpush.xpose.msk.msra.mxu0 %vm43_vm0, %v34_v4  ;;  %235 = vmatpush.xpose.msk.msra.mxu1 %vm43_vm0, %v34_v4 }
  0x16   :  { %239 = vmatpush.xpose.msk.msra.mxu2 %vm43_vm0, %v33_v5  ;;  %240 = vmatpush.xpose.msk.msra.mxu3 %vm43_vm0, %v33_v5 }
  0x17   :  { %204 = vmatpush.xpose.msk.msra.mxu0 %vm43_vm0, %v33_v5  ;;  %238 = vmatpush.xpose.msk.msra.mxu1 %vm43_vm0, %v33_v5 }
  0x1a   :  { %242 = vmatpush.xpose.msk.msra.mxu2 %vm43_vm0, %v32_v6  ;;  %243 = vmatpush.xpose.msk.msra.mxu3 %vm43_vm0, %v32_v6 }
  0x1b   :  { %205 = vmatpush.xpose.msk.msra.mxu0 %vm43_vm0, %v32_v6  ;;  %241 = vmatpush.xpose.msk.msra.mxu1 %vm43_vm0, %v32_v6 }
  0x1e   :  { %245 = vmatpush.xpose.msk.msra.mxu2 %vm43_vm0, %v31_v7  ;;  %246 = vmatpush.xpose.msk.msra.mxu3 %vm43_vm0, %v31_v7 }
  0x1f   :  { %206 = vmatpush.xpose.msk.msra.mxu0 %vm43_vm0, %v31_v7  ;;  %244 = vmatpush.xpose.msk.msra.mxu1 %vm43_vm0, %v31_v7 }
  0x22   :  { %248 = vmatpush.xpose.msk.msra.mxu2 %vm43_vm0, %v30_v8  ;;  %249 = vmatpush.xpose.msk.msra.mxu3 %vm43_vm0, %v30_v8 }
  0x23   :  { %207 = vmatpush.xpose.msk.msra.mxu0 %vm43_vm0, %v30_v8  ;;  %247 = vmatpush.xpose.msk.msra.mxu1 %vm43_vm0, %v30_v8 }
  0x26   :  { %251 = vmatpush.xpose.msk.msra.mxu2 %vm43_vm0, %v29_v9  ;;  %252 = vmatpush.xpose.msk.msra.mxu3 %vm43_vm0, %v29_v9 }
  0x27   :  { %208 = vmatpush.xpose.msk.msra.mxu0 %vm43_vm0, %v29_v9  ;;  %250 = vmatpush.xpose.msk.msra.mxu1 %vm43_vm0, %v29_v9 }
  0x2a   :  { %254 = vmatpush.xpose.msk.msra.mxu2 %vm43_vm0, %v28_v10  ;;  %255 = vmatpush.xpose.msk.msra.mxu3 %vm43_vm0, %v28_v10 }
  0x2b   :  { %209 = vmatpush.xpose.msk.msra.mxu0 %vm43_vm0, %v28_v10  ;;  %253 = vmatpush.xpose.msk.msra.mxu1 %vm43_vm0, %v28_v10 }
  0x2e   :  { %257 = vmatpush.xpose.msk.msra.mxu2 %vm43_vm0, %v27_v11  ;;  %258 = vmatpush.xpose.msk.msra.mxu3 %vm43_vm0, %v27_v11 }
  0x2f   :  { %210 = vmatpush.xpose.msk.msra.mxu0 %vm43_vm0, %v27_v11  ;;  %256 = vmatpush.xpose.msk.msra.mxu1 %vm43_vm0, %v27_v11 }
  0x32   :  { %260 = vmatpush.xpose.msk.msra.mxu2 %vm43_vm0, %v26_v12  ;;  %261 = vmatpush.xpose.msk.msra.mxu3 %vm43_vm0, %v26_v12 }
  0x33   :  { %211 = vmatpush.xpose.msk.msra.mxu0 %vm43_vm0, %v26_v12  ;;  %259 = vmatpush.xpose.msk.msra.mxu1 %vm43_vm0, %v26_v12 }
  0x36   :  { %263 = vmatpush.xpose.msk.msra.mxu2 %vm43_vm0, %v25_v13  ;;  %264 = vmatpush.xpose.msk.msra.mxu3 %vm43_vm0, %v25_v13 }
  0x37   :  { %212 = vmatpush.xpose.msk.msra.mxu0 %vm43_vm0, %v25_v13  ;;  %262 = vmatpush.xpose.msk.msra.mxu1 %vm43_vm0, %v25_v13 }
  0x3a   :  { %266 = vmatpush.xpose.msk.msra.mxu2 %vm43_vm0, %v24_v14  ;;  %267 = vmatpush.xpose.msk.msra.mxu3 %vm43_vm0, %v24_v14 }
  0x3b   :  { %213 = vmatpush.xpose.msk.msra.mxu0 %vm43_vm0, %v24_v14  ;;  %265 = vmatpush.xpose.msk.msra.mxu1 %vm43_vm0, %v24_v14 }
  0x3e   :  { %269 = vmatpush.xpose.msk.msra.mxu2 %vm43_vm0, %v23_v15  ;;  %270 = vmatpush.xpose.msk.msra.mxu3 %vm43_vm0, %v23_v15 }
  0x3f   :  { %214 = vmatpush.xpose.msk.msra.mxu0 %vm43_vm0, %v23_v15  ;;  %268 = vmatpush.xpose.msk.msra.mxu1 %vm43_vm0, %v23_v15 }
  0x41   :  { %219 = vmatmul.msk.f32.vlgmr.msra.gmra.mxu2 %vm43_vm0, %v19_v16  ;;  %221 = vmatmul.msk.f32.vlgmr.msra.gmra.mxu3 %vm43_vm0, %v21_v17 }
  0x42   :  { %215 = vmatmul.msk.f32.vlgmr.msra.gmra.mxu0 %vm43_vm0, %v15_v18  ;;  %217 = vmatmul.msk.f32.vlgmr.msra.gmra.mxu1 %vm43_vm0, %v17_v19 }
  0x49   :  { %220 = vmatmul.msk.f32.gmra.mxu2 %vm43_vm0, %v20_v20  ;;  %222 = vmatmul.msk.f32.gmra.mxu3 %vm43_vm0, %v22_v21 }
  0x4a   :  { %216 = vmatmul.msk.f32.gmra.mxu0 %vm43_vm0, %v16_v22  ;;  %218 = vmatmul.msk.f32.gmra.mxu1 %vm43_vm0, %v18_v23 }
  0xbf   :  { %v133_v25 = vpop.f32.mrf.mxu0  ;;  %v139_v26 = vpop.f32.mrf.mxu1 }
  0xc0   :  { %v134_v27 = vadd.f32 %v274_v24, %v133_v25  ;;  %v140_v28 = vadd.f32 %v274_v24, %v139_v26 }
  0xc2   :  { %v157_v29 = vmul.f32 0.01, %v134_v27  ;;  %v159_v30 = vmul.f32 0.01, %v140_v28 }
  0xc4   :  { %v165_v31 = vmax.f32 %v134_v27, %v157_v29  ;;  %v167_v32 = vmax.f32 %v140_v28, %v159_v30  ;;  %v145_v33 = vpop.f32.mrf.mxu2  ;;  %v151_v34 = vpop.f32.mrf.mxu3 }
  0xc5   :  { %v146_v35 = vadd.f32 %v274_v24, %v145_v33  ;;  %v152_v36 = vadd.f32 %v274_v24, %v151_v34 }
  0xc6   :  { %173 = vst [vmem:[#allocation2] sm:$0xff] %v165_v31 }
  0xc7   :  { %175 = vst [vmem:[#allocation2 + $0x10] sm:$0xff] %v167_v32  ;;  %v161_v37 = vmul.f32 0.01, %v146_v35  ;;  %v163_v38 = vmul.f32 0.01, %v152_v36  ;;  %v136_v39 = vpop.f32.mrf.mxu0  ;;  %v142_v40 = vpop.f32.mrf.mxu1 }
  0xc8   :  { %v137_v41 = vadd.f32 %v274_v24, %v136_v39  ;;  %v143_v42 = vadd.f32 %v274_v24, %v142_v40 }
  0xc9   :  { %v169_v43 = vmax.f32 %v146_v35, %v161_v37  ;;  %v171_v44 = vmax.f32 %v152_v36, %v163_v38 }
  0xca   :  { %v158_v45 = vmul.f32 0.01, %v137_v41  ;;  %v160_v46 = vmul.f32 0.01, %v143_v42 }
  0xcb   :  { %177 = vst [vmem:[#allocation2 + $0x20] sm:$0xff] %v169_v43 }
  0xcc   :  { %179 = vst [vmem:[#allocation2 + $0x30] sm:$0xff] %v171_v44  ;;  %v166_v47 = vmax.f32 %v137_v41, %v158_v45  ;;  %v168_v48 = vmax.f32 %v143_v42, %v160_v46  ;;  %v148_v49 = vpop.f32.mrf.mxu2  ;;  %v154_v50 = vpop.f32.mrf.mxu3 }
  0xcd   :  { %v149_v51 = vadd.f32 %v274_v24, %v148_v49  ;;  %v155_v52 = vadd.f32 %v274_v24, %v154_v50 }
  0xce   :  { %174 = vst [vmem:[#allocation2 + $0x8] sm:$0xff] %v166_v47 }
  0xcf   :  { %176 = vst [vmem:[#allocation2 + $0x18] sm:$0xff] %v168_v48  ;;  %v162_v53 = vmul.f32 0.01, %v149_v51  ;;  %v164_v54 = vmul.f32 0.01, %v155_v52 }
  0xd1   :  { %v170_v55 = vmax.f32 %v149_v51, %v162_v53  ;;  %v172_v56 = vmax.f32 %v155_v52, %v164_v54 }
  0xd3   :  { %178 = vst [vmem:[#allocation2 + $0x28] sm:$0xff] %v170_v55 }
  0xd4   :  { %180 = vst [vmem:[#allocation2 + $0x38] sm:$0xff] %v172_v56 }
  0xd5   :  { %193 = dma.vmem_to_hbm [thread:$0]  %s186_s2, 1024, %s188_s9, [#allocation3], %s302_s10, %s302_s10, %s303_s11  }
  0xd6   :  { %299 = dma.done.wait [#allocation3], 1024  }
  0xd7   :  { %300 = vsyncadd [#allocation3], 4294966272 }
  0xd8   :  { %198 = vsyncpa [#allocation3], 1 }

// kernel: sparse_linear_block.2
= control target key start
LH: loop header
LB: loop body
LE: loop exit
PB: predicated region body
PF: predicated region fallthrough
CT: control target
= control target key end

     0   :  { %vm68_vm0 = vcmask 261120   ;;  %v322_v24 = vmov 0.0   ;;  %s513_s1 = inlined_call_operand.vmem [shape: f32[128,32], index: 1, kind: input, shape index: {}]   ;;  %s514_s2 = inlined_call_operand.vmem [shape: f32[1,128], index: 2, kind: input, shape index: {}]   ;;  %s515_s0 = inlined_call_operand.vmem [shape: f32[64,32], index: 0, kind: input, shape index: {}]   ;;  %s516_s3 = inlined_call_operand.vmem [shape: f32[1,1,128], index: 3, kind: output, shape index: {0}]   ;;  %s517_s4 = inlined_call_operand.vmem [shape: f32[1,1,128], index: 4, kind: output, shape index: {1}]  }
   0x1   :  { %v67_v0 = vld [vmem:[%s513_s1 + $0x78] sm:$0xff]  ;;  %v66_v1 = vld [vmem:[%s513_s1 + $0x70] sm:$0xff]  ;;  %v65_v2 = vld [vmem:[%s513_s1 + $0x68] sm:$0xff]  ;;  %42 = vst [vmem:[%s516_s3] sm:$0x1] %v322_v24 }
   0x2   :  { %248 = vmatpush.xpose.msk.msra.mxu0 %vm68_vm0, %v67_v0  ;;  %273 = vmatpush.xpose.msk.msra.mxu2 %vm68_vm0, %v67_v0  ;;  %v64_v3 = vld [vmem:[%s513_s1 + $0x60] sm:$0xff]  ;;  %v63_v4 = vld [vmem:[%s513_s1 + $0x58] sm:$0xff]  ;;  %v62_v5 = vld [vmem:[%s513_s1 + $0x50] sm:$0xff]  ;;  %43 = vst [vmem:[%s517_s4] sm:$0x1] %v322_v24 }
   0x3   :  { %272 = vmatpush.xpose.msk.msra.mxu1 %vm68_vm0, %v67_v0  ;;  %274 = vmatpush.xpose.msk.msra.mxu3 %vm68_vm0, %v67_v0  ;;  %v61_v6 = vld [vmem:[%s513_s1 + $0x48] sm:$0xff]  ;;  %v60_v7 = vld [vmem:[%s513_s1 + $0x40] sm:$0xff]  ;;  %v59_v8 = vld [vmem:[%s513_s1 + $0x38] sm:$0xff] }
   0x4   :  { %v58_v9 = vld [vmem:[%s513_s1 + $0x30] sm:$0xff]  ;;  %v57_v10 = vld [vmem:[%s513_s1 + $0x28] sm:$0xff]  ;;  %v56_v11 = vld [vmem:[%s513_s1 + $0x20] sm:$0xff] }
   0x5   :  { %v55_v12 = vld [vmem:[%s513_s1 + $0x18] sm:$0xff]  ;;  %v54_v13 = vld [vmem:[%s513_s1 + $0x10] sm:$0xff]  ;;  %v53_v14 = vld [vmem:[%s513_s1 + $0x8] sm:$0xff] }
   0x6   :  { %249 = vmatpush.xpose.msk.msra.mxu0 %vm68_vm0, %v66_v1  ;;  %276 = vmatpush.xpose.msk.msra.mxu2 %vm68_vm0, %v66_v1  ;;  %v52_v15 = vld [vmem:[%s513_s1] sm:$0xff]  ;;  %v46_v18 = vld [vmem:[%s515_s0 + $0x10] sm:$0xff]  ;;  %v45_v20 = vld [vmem:[%s515_s0 + $0x8] sm:$0xff] }
   0x7   :  { %275 = vmatpush.xpose.msk.msra.mxu1 %vm68_vm0, %v66_v1  ;;  %277 = vmatpush.xpose.msk.msra.mxu3 %vm68_vm0, %v66_v1  ;;  %v44_v16 = vld [vmem:[%s515_s0] sm:$0xff]  ;;  %v50_v19 = vld [vmem:[%s515_s0 + $0x30] sm:$0xff]  ;;  %v49_v21 = vld [vmem:[%s515_s0 + $0x28] sm:$0xff] }
   0x8   :  { %v48_v17 = vld [vmem:[%s515_s0 + $0x20] sm:$0xff]  ;;  %v47_v22 = vld [vmem:[%s515_s0 + $0x18] sm:$0xff] }
   0x9   :  { %v51_v23 = vld [vmem:[%s515_s0 + $0x38] sm:$0xff]  ;;  %v321_v27 = vld [vmem:[%s514_s2] ss:$0 sm:$0xff] }
   0xa   :  { %250 = vmatpush.xpose.msk.msra.mxu0 %vm68_vm0, %v65_v2  ;;  %279 = vmatpush.xpose.msk.msra.mxu2 %vm68_vm0, %v65_v2 }
   0xb   :  { %278 = vmatpush.xpose.msk.msra.mxu1 %vm68_vm0, %v65_v2  ;;  %280 = vmatpush.xpose.msk.msra.mxu3 %vm68_vm0, %v65_v2 }
   0xe   :  { %251 = vmatpush.xpose.msk.msra.mxu0 %vm68_vm0, %v64_v3  ;;  %282 = vmatpush.xpose.msk.msra.mxu2 %vm68_vm0, %v64_v3 }
   0xf   :  { %281 = vmatpush.xpose.msk.msra.mxu1 %vm68_vm0, %v64_v3  ;;  %283 = vmatpush.xpose.msk.msra.mxu3 %vm68_vm0, %v64_v3 }
  0x12   :  { %252 = vmatpush.xpose.msk.msra.mxu0 %vm68_vm0, %v63_v4  ;;  %285 = vmatpush.xpose.msk.msra.mxu2 %vm68_vm0, %v63_v4 }
  0x13   :  { %284 = vmatpush.xpose.msk.msra.mxu1 %vm68_vm0, %v63_v4  ;;  %286 = vmatpush.xpose.msk.msra.mxu3 %vm68_vm0, %v63_v4 }
  0x16   :  { %253 = vmatpush.xpose.msk.msra.mxu0 %vm68_vm0, %v62_v5  ;;  %288 = vmatpush.xpose.msk.msra.mxu2 %vm68_vm0, %v62_v5 }
  0x17   :  { %287 = vmatpush.xpose.msk.msra.mxu1 %vm68_vm0, %v62_v5  ;;  %289 = vmatpush.xpose.msk.msra.mxu3 %vm68_vm0, %v62_v5 }
  0x1a   :  { %254 = vmatpush.xpose.msk.msra.mxu0 %vm68_vm0, %v61_v6  ;;  %291 = vmatpush.xpose.msk.msra.mxu2 %vm68_vm0, %v61_v6 }
  0x1b   :  { %290 = vmatpush.xpose.msk.msra.mxu1 %vm68_vm0, %v61_v6  ;;  %292 = vmatpush.xpose.msk.msra.mxu3 %vm68_vm0, %v61_v6 }
  0x1e   :  { %255 = vmatpush.xpose.msk.msra.mxu0 %vm68_vm0, %v60_v7  ;;  %294 = vmatpush.xpose.msk.msra.mxu2 %vm68_vm0, %v60_v7 }
  0x1f   :  { %293 = vmatpush.xpose.msk.msra.mxu1 %vm68_vm0, %v60_v7  ;;  %295 = vmatpush.xpose.msk.msra.mxu3 %vm68_vm0, %v60_v7 }
  0x22   :  { %256 = vmatpush.xpose.msk.msra.mxu0 %vm68_vm0, %v59_v8  ;;  %297 = vmatpush.xpose.msk.msra.mxu2 %vm68_vm0, %v59_v8 }
  0x23   :  { %296 = vmatpush.xpose.msk.msra.mxu1 %vm68_vm0, %v59_v8  ;;  %298 = vmatpush.xpose.msk.msra.mxu3 %vm68_vm0, %v59_v8 }
  0x26   :  { %257 = vmatpush.xpose.msk.msra.mxu0 %vm68_vm0, %v58_v9  ;;  %300 = vmatpush.xpose.msk.msra.mxu2 %vm68_vm0, %v58_v9 }
  0x27   :  { %299 = vmatpush.xpose.msk.msra.mxu1 %vm68_vm0, %v58_v9  ;;  %301 = vmatpush.xpose.msk.msra.mxu3 %vm68_vm0, %v58_v9  ;;  %v194_v9 = vld [vmem:[%s516_s3] sm:$0x1] }
  0x2a   :  { %258 = vmatpush.xpose.msk.msra.mxu0 %vm68_vm0, %v57_v10  ;;  %303 = vmatpush.xpose.msk.msra.mxu2 %vm68_vm0, %v57_v10 }
  0x2b   :  { %302 = vmatpush.xpose.msk.msra.mxu1 %vm68_vm0, %v57_v10  ;;  %304 = vmatpush.xpose.msk.msra.mxu3 %vm68_vm0, %v57_v10 }
  0x2e   :  { %259 = vmatpush.xpose.msk.msra.mxu0 %vm68_vm0, %v56_v11  ;;  %306 = vmatpush.xpose.msk.msra.mxu2 %vm68_vm0, %v56_v11 }
  0x2f   :  { %305 = vmatpush.xpose.msk.msra.mxu1 %vm68_vm0, %v56_v11  ;;  %307 = vmatpush.xpose.msk.msra.mxu3 %vm68_vm0, %v56_v11 }
  0x32   :  { %260 = vmatpush.xpose.msk.msra.mxu0 %vm68_vm0, %v55_v12  ;;  %309 = vmatpush.xpose.msk.msra.mxu2 %vm68_vm0, %v55_v12 }
  0x33   :  { %308 = vmatpush.xpose.msk.msra.mxu1 %vm68_vm0, %v55_v12  ;;  %310 = vmatpush.xpose.msk.msra.mxu3 %vm68_vm0, %v55_v12  ;;  %v210_v12 = vld [vmem:[%s517_s4] sm:$0x1] }
  0x36   :  { %261 = vmatpush.xpose.msk.msra.mxu0 %vm68_vm0, %v54_v13  ;;  %312 = vmatpush.xpose.msk.msra.mxu2 %vm68_vm0, %v54_v13 }
  0x37   :  { %311 = vmatpush.xpose.msk.msra.mxu1 %vm68_vm0, %v54_v13  ;;  %313 = vmatpush.xpose.msk.msra.mxu3 %vm68_vm0, %v54_v13 }
  0x3a   :  { %262 = vmatpush.xpose.msk.msra.mxu0 %vm68_vm0, %v53_v14  ;;  %315 = vmatpush.xpose.msk.msra.mxu2 %vm68_vm0, %v53_v14 }
  0x3b   :  { %314 = vmatpush.xpose.msk.msra.mxu1 %vm68_vm0, %v53_v14  ;;  %316 = vmatpush.xpose.msk.msra.mxu3 %vm68_vm0, %v53_v14 }
  0x3e   :  { %263 = vmatpush.xpose.msk.msra.mxu0 %vm68_vm0, %v52_v15  ;;  %318 = vmatpush.xpose.msk.msra.mxu2 %vm68_vm0, %v52_v15 }
  0x3f   :  { %317 = vmatpush.xpose.msk.msra.mxu1 %vm68_vm0, %v52_v15  ;;  %319 = vmatpush.xpose.msk.msra.mxu3 %vm68_vm0, %v52_v15 }
  0x41   :  { %264 = vmatmul.msk.f32.vlgmr.msra.gmra.mxu0 %vm68_vm0, %v44_v16  ;;  %268 = vmatmul.msk.f32.vlgmr.msra.gmra.mxu2 %vm68_vm0, %v48_v17 }
  0x42   :  { %266 = vmatmul.msk.f32.vlgmr.msra.gmra.mxu1 %vm68_vm0, %v46_v18  ;;  %270 = vmatmul.msk.f32.vlgmr.msra.gmra.mxu3 %vm68_vm0, %v50_v19 }
  0x49   :  { %265 = vmatmul.msk.f32.gmra.mxu0 %vm68_vm0, %v45_v20  ;;  %269 = vmatmul.msk.f32.gmra.mxu2 %vm68_vm0, %v49_v21 }
  0x4a   :  { %267 = vmatmul.msk.f32.gmra.mxu1 %vm68_vm0, %v47_v22  ;;  %271 = vmatmul.msk.f32.gmra.mxu3 %vm68_vm0, %v51_v23 }
  0xbe   :  { %v158_v25 = vpop.f32.mrf.mxu0 }
  0xbf   :  { %v164_v26 = vpop.f32.mrf.mxu1  ;;  %v186_v29 = vsub.f32 %v158_v25, %v321_v27 }
  0xc0   :  { %v188_v32 = vsub.f32 %v164_v26, %v321_v27 }
  0xc1   :  { %v211_v36 = vmul.f32 %v186_v29, %v186_v29 }
  0xc2   :  { %v213_v40 = vmul.f32 %v188_v32, %v188_v32 }
  0xc4   :  { %v170_v28 = vpop.f32.mrf.mxu2 }
  0xc5   :  { %v176_v30 = vpop.f32.mrf.mxu3  ;;  %v190_v39 = vsub.f32 %v170_v28, %v321_v27 }
  0xc6   :  { %v161_v31 = vpop.f32.mrf.mxu0  ;;  %v192_v50 = vsub.f32 %v176_v30, %v321_v27 }
  0xc7   :  { %v187_v33 = vsub.f32 %v161_v31, %v321_v27  ;;  %v167_v34 = vpop.f32.mrf.mxu1  ;;  %v215_v49 = vmul.f32 %v190_v39, %v190_v39 }
  0xc8   :  { %v189_v35 = vsub.f32 %v167_v34, %v321_v27  ;;  %v217_v57 = vmul.f32 %v192_v50, %v192_v50 }
  0xc9   :  { %v195_v37 = vadd.f32 %v187_v33, %v186_v29  ;;  %v212_v38 = vmul.f32 %v187_v33, %v187_v33 }
  0xca   :  { %v214_v43 = vmul.f32 %v189_v35, %v189_v35 }
  0xcb   :  { %v219_v41 = vadd.f32 %v212_v38, %v211_v36  ;;  %v196_v42 = vadd.f32 %v195_v37, %v188_v32 }
  0xcc   :  { %v173_v44 = vpop.f32.mrf.mxu2 }
  0xcd   :  { %v197_v45 = vadd.f32 %v196_v42, %v189_v35  ;;  %v220_v46 = vadd.f32 %v219_v41, %v213_v40  ;;  %v191_v47 = vsub.f32 %v173_v44, %v321_v27  ;;  %v179_v48 = vpop.f32.mrf.mxu3 }
  0xce   :  { %v193_v54 = vsub.f32 %v179_v48, %v321_v27 }
  0xcf   :  { %v221_v51 = vadd.f32 %v220_v46, %v214_v43  ;;  %v198_v52 = vadd.f32 %v197_v45, %v190_v39  ;;  %v216_v53 = vmul.f32 %v191_v47, %v191_v47 }
  0xd0   :  { %v218_v60 = vmul.f32 %v193_v54, %v193_v54 }
  0xd1   :  { %v199_v55 = vadd.f32 %v198_v52, %v191_v47  ;;  %v222_v56 = vadd.f32 %v221_v51, %v215_v49 }
  0xd3   :  { %v223_v58 = vadd.f32 %v222_v56, %v216_v53  ;;  %v200_v59 = vadd.f32 %v199_v55, %v192_v50 }
  0xd5   :  { %v201_v61 = vadd.f32 %v200_v59, %v193_v54  ;;  %v224_v62 = vadd.f32 %v223_v58, %v217_v57 }
  0xd7   :  { %v202_v63 = vrot.slane %v201_v61, 4  ;;  %v225_v0 = vadd.f32 %v224_v62, %v218_v60 }
  0xd9   :  { %v203_v1 = vadd.f32 %v202_v63, %v201_v61  ;;  %v226_v2 = vrot.slane %v225_v0, 4 }
  0xdb   :  { %v204_v3 = vrot.slane %v203_v1, 2  ;;  %v227_v4 = vadd.f32 %v226_v2, %v225_v0 }
  0xdd   :  { %v205_v5 = vadd.f32 %v204_v3, %v203_v1  ;;  %v228_v6 = vrot.slane %v227_v4, 2 }
  0xdf   :  { %v206_v7 = vrot.slane %v205_v5, 1  ;;  %v229_v8 = vadd.f32 %v228_v6, %v227_v4 }
  0xe1   :  { %v207_v10 = vadd.f32 %v206_v7, %v205_v5  ;;  %v230_v11 = vrot.slane %v229_v8, 1 }
  0xe3   :  { %v208_v13 = vadd.f32 %v207_v10, %v194_v9  ;;  %v231_v14 = vadd.f32 %v230_v11, %v229_v8 }
  0xe5   :  { %209 = vst [vmem:[%s516_s3] sm:$0x1] %v208_v13  ;;  %v232_v15 = vadd.f32 %v231_v14, %v210_v12 }
  0xe7   :  { %233 = vst [vmem:[%s517_s4] sm:$0x1] %v232_v15 }

</bundles_post_ra>
